<compile_context>
chip_gen: v7x
topology: tpu7x:2x2x1
jax: 0.10.0
libtpu: 0.0.40
codegen_flags: <defaults>
</compile_context>

<pallas_src>
import functools

import jax
import jax.numpy as jnp
from jax.experimental import pallas as pl
from jax.experimental.pallas import tpu as pltpu


def _round_up(x, m):
    return (x + m - 1) // m * m


# ----------------------------------------------------------------------------
# Pallas kernel: one grid step == one block of `tb` timesteps for one batch
# shard of size `nb`.  h/c are carried across time blocks in VMEM scratch.
# ----------------------------------------------------------------------------
def _lstm_block_kernel(x_ref, wih_ref, whh_ref, b_ref, y_ref,
                       h_ref, c_ref, gates_ref, *, tb, nb, hidden, reverse):
    t_blk = pl.program_id(1)

    # Fresh h/c at the start of each batch shard's (sequential) time sweep.
    @pl.when(t_blk == 0)
    def _():
        h_ref[...] = jnp.zeros_like(h_ref)
        c_ref[...] = jnp.zeros_like(c_ref)

    # ---- Block-level input projection (time-independent part of the gates).
    # One MXU-shaped matmul covering all tb timesteps of this block:
    # (tb*nb, I) @ (I, 4H) + b.  nb is a multiple of 8, so the leading-dim
    # merge is a clean sublane merge.
    x_blk = x_ref[...].reshape(tb * nb, x_ref.shape[-1])
    gates_ref[...] = (
        jnp.dot(x_blk, wih_ref[...], preferred_element_type=jnp.float32)
        + b_ref[...])

    whh = whh_ref[...]          # (H, 4H), grid-resident weight
    H = hidden

    def step(i, carry):
        h, c = carry
        # Local timestep index inside this block.  For reverse, the block
        # order is reversed by the index_map and the in-block order here.
        lt = tb - 1 - i if reverse else i
        row = pl.multiple_of(lt * nb, nb)
        g = gates_ref[pl.ds(row, nb), :] + jnp.dot(
            h, whh, preferred_element_type=jnp.float32)          # (nb, 4H)
        # PyTorch gate order: i, f, g, o.  (Real bonito hidden sizes are
        # multiples of 128, making these slices lane-aligned free views.)
        i_g = jax.nn.sigmoid(g[:, 0 * H:1 * H])
        f_g = jax.nn.sigmoid(g[:, 1 * H:2 * H])
        g_g = jnp.tanh(g[:, 2 * H:3 * H])
        o_g = jax.nn.sigmoid(g[:, 3 * H:4 * H])
        c = f_g * c + i_g * g_g
        h = o_g * jnp.tanh(c)
        y_ref[lt] = h.astype(y_ref.dtype)
        return h, c

    h_fin, c_fin = jax.lax.fori_loop(
        0, tb, step, (h_ref[...], c_ref[...]), unroll=True)
    h_ref[...] = h_fin
    c_ref[...] = c_fin


def lstm_pallas(x, w_ih, w_hh, b_ih, *, reverse=False, tb=32, nb=None):
    """x: (T, N, I) f32; w_ih: (4H, I); w_hh: (4H, H); b_ih: (4H,) -> (T, N, H)."""
    T, N, I = x.shape
    fourH, H = w_hh.shape
    assert fourH == 4 * H
    assert w_ih.shape == (fourH, I)

    tb = max(1, min(tb, T))
    t_pad = _round_up(T, tb)
    n_pad = _round_up(N, 8)            # fill the f32 sublane width
    if nb is None:
        # Split the batch into two shards when possible so the "parallel"
        # grid axis can be sharded across TensorCores (v7x megacore).
        nb = n_pad // 2 if (n_pad % 16 == 0) else n_pad
    assert n_pad % nb == 0 and nb % 8 == 0

    pad_t, pad_n = t_pad - T, n_pad - N
    if pad_t or pad_n:
        # For reverse, pad at the *front* of time so the (discarded) padded
        # steps are processed after all real steps and cannot corrupt h/c.
        tpad_cfg = (pad_t, 0) if reverse else (0, pad_t)
        x = jnp.pad(x, (tpad_cfg, (0, pad_n), (0, 0)))

    wih_t = jnp.transpose(w_ih)        # (I, 4H)
    whh_t = jnp.transpose(w_hh)        # (H, 4H)
    b = b_ih.reshape(1, fourH)         # (1, 4H)

    n_blocks = n_pad // nb
    nt = t_pad // tb

    # Time-reversal is folded into the index_map: zero extra HBM traffic.
    if reverse:
        xy_map = lambda bi, ti: (nt - 1 - ti, bi, 0)
    else:
        xy_map = lambda bi, ti: (ti, bi, 0)
    const_map = lambda bi, ti: (0, 0)

    kernel = functools.partial(_lstm_block_kernel, tb=tb, nb=nb, hidden=H,
                               reverse=reverse)

    # Explicit VMEM budget: double-buffered x/y blocks + resident weights +
    # h/c/gate scratch + slack.  Floors at 32 MiB (safe on v5e/v6e/v7x).
    f32b = 4
    needed = (2 * (tb * nb * I + tb * nb * H) * f32b
              + 2 * (I * fourH + H * fourH + fourH) * f32b
              + (2 * nb * H + tb * nb * fourH) * f32b
              + (2 << 20))
    vmem_limit = int(max(needed, 32 * 1024 * 1024))

    grid_spec = pltpu.PrefetchScalarGridSpec(
        num_scalar_prefetch=0,
        grid=(n_blocks, nt),
        in_specs=[
            pl.BlockSpec((tb, nb, I), xy_map),       # x block (tb timesteps)
            pl.BlockSpec((I, fourH), const_map),     # W_ih^T (resident)
            pl.BlockSpec((H, fourH), const_map),     # W_hh^T (resident)
            pl.BlockSpec((1, fourH), const_map),     # bias
        ],
        out_specs=pl.BlockSpec((tb, nb, H), xy_map),
        scratch_shapes=[
            pltpu.VMEM((nb, H), jnp.float32),            # h carry
            pltpu.VMEM((nb, H), jnp.float32),            # c carry
            pltpu.VMEM((tb * nb, fourH), jnp.float32),   # block gate buffer
        ],
    )

    y = pl.pallas_call(
        kernel,
        out_shape=jax.ShapeDtypeStruct((t_pad, n_pad, H), x.dtype),
        grid_spec=grid_spec,
        compiler_params=pltpu.CompilerParams(
            dimension_semantics=("parallel", "arbitrary"),  # batch ∥, time seq
            vmem_limit_bytes=vmem_limit),
    )(x, wih_t, whh_t, b)

    if reverse:
        return y[pad_t:, :N]
    return y[:T, :N]


# ----------------------------------------------------------------------------
# RNNWrapper.forward equivalent (reverse handled inside the kernel).
# ----------------------------------------------------------------------------
def rnn_wrapper_forward(x, params, reverse=False, tb=32, nb=None):
    return lstm_pallas(x, params["weight_ih"], params["weight_hh"],
                       params["bias_ih"], reverse=reverse, tb=tb, nb=nb)


# ----------------------------------------------------------------------------
# Deterministic parameter init matching RNNWrapper.__init__ semantics.
# ----------------------------------------------------------------------------
def init_params(key, input_size, hidden_size):
    k_ih, k_hh, k_b = jax.random.split(key, 3)
    ortho = jax.nn.initializers.orthogonal()

    # weight_ih: (4H, I), orthogonal per hidden_size block
    w_ih = jnp.concatenate(
        [ortho(kk, (hidden_size, input_size), jnp.float32)
         for kk in jax.random.split(k_ih, 4)], axis=0)

    # weight_hh: (4H, H), orthogonal per hidden_size block
    w_hh = jnp.concatenate(
        [ortho(kk, (hidden_size, hidden_size), jnp.float32)
         for kk in jax.random.split(k_hh, 4)], axis=0)

    # bias_ih = 0.5 * truncated_normal, bias_hh zeroed (disable_state_bias)
    b_ih = 0.5 * jax.random.truncated_normal(
        k_b, -2.0, 2.0, (4 * hidden_size,), jnp.float32)
    return {"weight_ih": w_ih, "weight_hh": w_hh, "bias_ih": b_ih}


# ----------------------------------------------------------------------------
# Pure-JAX reference (lax.scan) for correctness check.
# ----------------------------------------------------------------------------
def lstm_ref(x, w_ih, w_hh, b_ih):
    H = w_hh.shape[1]
    N = x.shape[1]

    def step(carry, x_t):
        h, c = carry
        gates = x_t @ w_ih.T + h @ w_hh.T + b_ih
        i_g = jax.nn.sigmoid(gates[:, 0 * H:1 * H])
        f_g = jax.nn.sigmoid(gates[:, 1 * H:2 * H])
        g_g = jnp.tanh(gates[:, 2 * H:3 * H])
        o_g = jax.nn.sigmoid(gates[:, 3 * H:4 * H])
        c = f_g * c + i_g * g_g
        h = o_g * jnp.tanh(c)
        return (h, c), h

    init = (jnp.zeros((N, H), jnp.float32), jnp.zeros((N, H), jnp.float32))
    _, ys = jax.lax.scan(step, init, x)
    return ys


def rnn_wrapper_ref(x, params, reverse=False):
    if reverse:
        x = jnp.flip(x, axis=0)
    y = lstm_ref(x, params["weight_ih"], params["weight_hh"], params["bias_ih"])
    if reverse:
        y = jnp.flip(y, axis=0)
    return y


if __name__ == "__main__":
    key = jax.random.PRNGKey(0)

    # (T, N, I, H, reverse, tb)  -- small shapes; tb=None -> default (min(32,T))
    configs = [
        (8, 2, 16, 32, True, None),    # the RNNWrapper reverse path
        (8, 2, 16, 32, False, None),   # forward path
        (13, 5, 16, 32, True, 4),      # exercises time + batch padding
    ]
    for idx, (T, N, I, H, reverse, tb) in enumerate(configs):
        k_x, k_p, key = jax.random.split(key, 3)
        x = jax.random.normal(k_x, (T, N, I), jnp.float32)
        params = init_params(k_p, I, H)
        kwargs = {} if tb is None else {"tb": tb}
        y = rnn_wrapper_forward(x, params, reverse=reverse, **kwargs)
        y = jax.block_until_ready(y)
        y_ref = rnn_wrapper_ref(x, params, reverse=reverse)
        assert y.shape == (T, N, H)
        assert jnp.allclose(y, y_ref, rtol=1e-3, atol=1e-3), \
            f"mismatch vs reference in config {idx}"

    print("KERNEL_OK")
</pallas_src>

<mosaic_0001>
module attributes {stable_mosaic.version = 11 : i64} {
  func.func @_lstm_block_kernel(%arg0: i32, %arg1: i32, %arg2: memref<8x8x16xf32, #tpu.memory_space<vmem>>, %arg3: memref<16x128xf32, #tpu.memory_space<vmem>>, %arg4: memref<32x128xf32, #tpu.memory_space<vmem>>, %arg5: memref<1x128xf32, #tpu.memory_space<vmem>>, %arg6: memref<8x8x32xf32, #tpu.memory_space<vmem>>, %arg7: memref<8x32xf32, #tpu.memory_space<vmem>>, %arg8: memref<8x32xf32, #tpu.memory_space<vmem>>, %arg9: memref<64x128xf32, #tpu.memory_space<vmem>>) attributes {dimension_semantics = [#tpu.dimension_semantics<parallel>, #tpu.dimension_semantics<arbitrary>], iteration_bounds = array<i64: 1, 1>, scalar_prefetch = 0 : i64, scratch_operands = 3 : i64, tpu.core_type = #tpu.core_type<tc>, window_params = [{transform_indices = @transform_0, window_bounds = array<i64: 8, 8, 16>}, {pipeline_mode = #tpu.pipeline_mode<synchronous>, transform_indices = @transform_1, window_bounds = array<i64: 16, 128>}, {pipeline_mode = #tpu.pipeline_mode<synchronous>, transform_indices = @transform_2, window_bounds = array<i64: 32, 128>}, {pipeline_mode = #tpu.pipeline_mode<synchronous>, transform_indices = @transform_3, window_bounds = array<i64: 1, 128>}, {transform_indices = @transform_4, window_bounds = array<i64: 8, 8, 32>}]} {
    %c0_i32 = arith.constant 0 : i32
    %0 = arith.cmpi eq, %arg1, %c0_i32 : i32
    %1 = arith.extui %0 : i1 to i32
    %c0_i32_0 = arith.constant 0 : i32
    %2 = arith.cmpi ne, %1, %c0_i32_0 : i32
    scf.if %2 {
      %cst_92 = arith.constant 0.000000e+00 : f32
      %304 = vector.broadcast %cst_92 : f32 to vector<8x32xf32>
      %c0_93 = arith.constant 0 : index
      %c0_94 = arith.constant 0 : index
      %305 = vector.load %arg7[%c0_93, %c0_94] : memref<8x32xf32, #tpu.memory_space<vmem>>, vector<8x32xf32>
      tpu.vector_store %arg7[%c0_93, %c0_94], %304 {strides = array<i32>} : memref<8x32xf32, #tpu.memory_space<vmem>>, vector<8x32xf32>,
      %cst_95 = arith.constant 0.000000e+00 : f32
      %306 = vector.broadcast %cst_95 : f32 to vector<8x32xf32>
      %c0_96 = arith.constant 0 : index
      %c0_97 = arith.constant 0 : index
      %307 = vector.load %arg8[%c0_96, %c0_97] : memref<8x32xf32, #tpu.memory_space<vmem>>, vector<8x32xf32>
      tpu.vector_store %arg8[%c0_96, %c0_97], %306 {strides = array<i32>} : memref<8x32xf32, #tpu.memory_space<vmem>>, vector<8x32xf32>,
    } else {
    }
    %c0 = arith.constant 0 : index
    %c0_1 = arith.constant 0 : index
    %c0_2 = arith.constant 0 : index
    %3 = vector.load %arg2[%c0, %c0_1, %c0_2] : memref<8x8x16xf32, #tpu.memory_space<vmem>>, vector<8x8x16xf32>
    %4 = vector.shape_cast %3 : vector<8x8x16xf32> to vector<64x16xf32>
    %c0_3 = arith.constant 0 : index
    %c0_4 = arith.constant 0 : index
    %5 = vector.load %arg3[%c0_3, %c0_4] : memref<16x128xf32, #tpu.memory_space<vmem>>, vector<16x128xf32>
    %cst = arith.constant dense<0.000000e+00> : vector<64x128xf32>
    %6 = tpu.matmul %4, %5, %cst {dimension_numbers = #tpu.dot_dimension_numbers<[1], [0], [0], [1], [0, 0, 1, 1], [], []>} : vector<64x16xf32>, vector<16x128xf32>, vector<64x128xf32> -> vector<64x128xf32>
    %c0_5 = arith.constant 0 : index
    %c0_6 = arith.constant 0 : index
    %7 = vector.load %arg5[%c0_5, %c0_6] : memref<1x128xf32, #tpu.memory_space<vmem>>, vector<1x128xf32>
    %8 = vector.broadcast %7 : vector<1x128xf32> to vector<64x128xf32>
    %9 = arith.addf %6, %8 : vector<64x128xf32>
    %c0_7 = arith.constant 0 : index
    %c0_8 = arith.constant 0 : index
    %10 = vector.load %arg9[%c0_7, %c0_8] : memref<64x128xf32, #tpu.memory_space<vmem>>, vector<64x128xf32>
    tpu.vector_store %arg9[%c0_7, %c0_8], %9 {strides = array<i32>} : memref<64x128xf32, #tpu.memory_space<vmem>>, vector<64x128xf32>,
    %c0_9 = arith.constant 0 : index
    %c0_10 = arith.constant 0 : index
    %11 = vector.load %arg4[%c0_9, %c0_10] : memref<32x128xf32, #tpu.memory_space<vmem>>, vector<32x128xf32>
    %c0_11 = arith.constant 0 : index
    %c0_12 = arith.constant 0 : index
    %12 = vector.load %arg7[%c0_11, %c0_12] : memref<8x32xf32, #tpu.memory_space<vmem>>, vector<8x32xf32>
    %c0_13 = arith.constant 0 : index
    %c0_14 = arith.constant 0 : index
    %13 = vector.load %arg8[%c0_13, %c0_14] : memref<8x32xf32, #tpu.memory_space<vmem>>, vector<8x32xf32>
    %c0_i32_15 = arith.constant 0 : i32
    %c7_i32 = arith.constant 7 : i32
    %14 = arith.subi %c7_i32, %c0_i32_15 : i32
    %c8_i32 = arith.constant 8 : i32
    %15 = arith.muli %14, %c8_i32 : i32
    %16 = tpu.assume_multiple %15, 8 : i32
    %17 = arith.index_cast %16 : i32 to index
    %c0_16 = arith.constant 0 : index
    %18 = vector.load %arg9[%17, %c0_16] : memref<64x128xf32, #tpu.memory_space<vmem>>, vector<8x128xf32>
    %cst_17 = arith.constant dense<0.000000e+00> : vector<8x128xf32>
    %19 = tpu.matmul %12, %11, %cst_17 {dimension_numbers = #tpu.dot_dimension_numbers<[1], [0], [0], [1], [0, 0, 1, 1], [], []>} : vector<8x32xf32>, vector<32x128xf32>, vector<8x128xf32> -> vector<8x128xf32>
    %20 = arith.addf %18, %19 : vector<8x128xf32>
    %21 = vector.extract_strided_slice %20 {offsets = [0, 0], sizes = [8, 32], strides = [1, 1]} : vector<8x128xf32> to vector<8x32xf32>
    %22 = arith.negf %21 : vector<8x32xf32>
    %23 = math.exp %22 : vector<8x32xf32>
    %cst_18 = arith.constant 1.000000e+00 : f32
    %24 = vector.broadcast %cst_18 : f32 to vector<8x32xf32>
    %25 = arith.addf %24, %23 : vector<8x32xf32>
    %26 = arith.divf %24, %25 : vector<8x32xf32>
    %27 = vector.extract_strided_slice %20 {offsets = [0, 32], sizes = [8, 32], strides = [1, 1]} : vector<8x128xf32> to vector<8x32xf32>
    %28 = arith.negf %27 : vector<8x32xf32>
    %29 = math.exp %28 : vector<8x32xf32>
    %cst_19 = arith.constant 1.000000e+00 : f32
    %30 = vector.broadcast %cst_19 : f32 to vector<8x32xf32>
    %31 = arith.addf %30, %29 : vector<8x32xf32>
    %32 = arith.divf %30, %31 : vector<8x32xf32>
    %33 = vector.extract_strided_slice %20 {offsets = [0, 64], sizes = [8, 32], strides = [1, 1]} : vector<8x128xf32> to vector<8x32xf32>
    %34 = math.tanh %33 : vector<8x32xf32>
    %35 = vector.extract_strided_slice %20 {offsets = [0, 96], sizes = [8, 32], strides = [1, 1]} : vector<8x128xf32> to vector<8x32xf32>
    %36 = arith.negf %35 : vector<8x32xf32>
    %37 = math.exp %36 : vector<8x32xf32>
    %cst_20 = arith.constant 1.000000e+00 : f32
    %38 = vector.broadcast %cst_20 : f32 to vector<8x32xf32>
    %39 = arith.addf %38, %37 : vector<8x32xf32>
    %40 = arith.divf %38, %39 : vector<8x32xf32>
    %41 = arith.mulf %32, %13 : vector<8x32xf32>
    %42 = arith.mulf %26, %34 : vector<8x32xf32>
    %43 = arith.addf %41, %42 : vector<8x32xf32>
    %44 = math.tanh %43 : vector<8x32xf32>
    %45 = arith.mulf %40, %44 : vector<8x32xf32>
    %46 = arith.index_cast %14 : i32 to index
    %c0_21 = arith.constant 0 : index
    %c0_22 = arith.constant 0 : index
    %47 = vector.load %arg6[%46, %c0_21, %c0_22] : memref<8x8x32xf32, #tpu.memory_space<vmem>>, vector<1x8x32xf32>
    %48 = vector.shape_cast %47 : vector<1x8x32xf32> to vector<8x32xf32>
    %49 = vector.shape_cast %45 : vector<8x32xf32> to vector<1x8x32xf32>
    tpu.vector_store %arg6[%46, %c0_21, %c0_22], %49 {strides = array<i32>} : memref<8x8x32xf32, #tpu.memory_space<vmem>>, vector<1x8x32xf32>,
    %c1_i32 = arith.constant 1 : i32
    %c7_i32_23 = arith.constant 7 : i32
    %50 = arith.subi %c7_i32_23, %c1_i32 : i32
    %c8_i32_24 = arith.constant 8 : i32
    %51 = arith.muli %50, %c8_i32_24 : i32
    %52 = tpu.assume_multiple %51, 8 : i32
    %53 = arith.index_cast %52 : i32 to index
    %c0_25 = arith.constant 0 : index
    %54 = vector.load %arg9[%53, %c0_25] : memref<64x128xf32, #tpu.memory_space<vmem>>, vector<8x128xf32>
    %cst_26 = arith.constant dense<0.000000e+00> : vector<8x128xf32>
    %55 = tpu.matmul %45, %11, %cst_26 {dimension_numbers = #tpu.dot_dimension_numbers<[1], [0], [0], [1], [0, 0, 1, 1], [], []>} : vector<8x32xf32>, vector<32x128xf32>, vector<8x128xf32> -> vector<8x128xf32>
    %56 = arith.addf %54, %55 : vector<8x128xf32>
    %57 = vector.extract_strided_slice %56 {offsets = [0, 0], sizes = [8, 32], strides = [1, 1]} : vector<8x128xf32> to vector<8x32xf32>
    %58 = arith.negf %57 : vector<8x32xf32>
    %59 = math.exp %58 : vector<8x32xf32>
    %cst_27 = arith.constant 1.000000e+00 : f32
    %60 = vector.broadcast %cst_27 : f32 to vector<8x32xf32>
    %61 = arith.addf %60, %59 : vector<8x32xf32>
    %62 = arith.divf %60, %61 : vector<8x32xf32>
    %63 = vector.extract_strided_slice %56 {offsets = [0, 32], sizes = [8, 32], strides = [1, 1]} : vector<8x128xf32> to vector<8x32xf32>
    %64 = arith.negf %63 : vector<8x32xf32>
    %65 = math.exp %64 : vector<8x32xf32>
    %cst_28 = arith.constant 1.000000e+00 : f32
    %66 = vector.broadcast %cst_28 : f32 to vector<8x32xf32>
    %67 = arith.addf %66, %65 : vector<8x32xf32>
    %68 = arith.divf %66, %67 : vector<8x32xf32>
    %69 = vector.extract_strided_slice %56 {offsets = [0, 64], sizes = [8, 32], strides = [1, 1]} : vector<8x128xf32> to vector<8x32xf32>
    %70 = math.tanh %69 : vector<8x32xf32>
    %71 = vector.extract_strided_slice %56 {offsets = [0, 96], sizes = [8, 32], strides = [1, 1]} : vector<8x128xf32> to vector<8x32xf32>
    %72 = arith.negf %71 : vector<8x32xf32>
    %73 = math.exp %72 : vector<8x32xf32>
    %cst_29 = arith.constant 1.000000e+00 : f32
    %74 = vector.broadcast %cst_29 : f32 to vector<8x32xf32>
    %75 = arith.addf %74, %73 : vector<8x32xf32>
    %76 = arith.divf %74, %75 : vector<8x32xf32>
    %77 = arith.mulf %68, %43 : vector<8x32xf32>
    %78 = arith.mulf %62, %70 : vector<8x32xf32>
    %79 = arith.addf %77, %78 : vector<8x32xf32>
    %80 = math.tanh %79 : vector<8x32xf32>
    %81 = arith.mulf %76, %80 : vector<8x32xf32>
    %82 = arith.index_cast %50 : i32 to index
    %c0_30 = arith.constant 0 : index
    %c0_31 = arith.constant 0 : index
    %83 = vector.load %arg6[%82, %c0_30, %c0_31] : memref<8x8x32xf32, #tpu.memory_space<vmem>>, vector<1x8x32xf32>
    %84 = vector.shape_cast %83 : vector<1x8x32xf32> to vector<8x32xf32>
    %85 = vector.shape_cast %81 : vector<8x32xf32> to vector<1x8x32xf32>
    tpu.vector_store %arg6[%82, %c0_30, %c0_31], %85 {strides = array<i32>} : memref<8x8x32xf32, #tpu.memory_space<vmem>>, vector<1x8x32xf32>,
    %c2_i32 = arith.constant 2 : i32
    %c7_i32_32 = arith.constant 7 : i32
    %86 = arith.subi %c7_i32_32, %c2_i32 : i32
    %c8_i32_33 = arith.constant 8 : i32
    %87 = arith.muli %86, %c8_i32_33 : i32
    %88 = tpu.assume_multiple %87, 8 : i32
    %89 = arith.index_cast %88 : i32 to index
    %c0_34 = arith.constant 0 : index
    %90 = vector.load %arg9[%89, %c0_34] : memref<64x128xf32, #tpu.memory_space<vmem>>, vector<8x128xf32>
    %cst_35 = arith.constant dense<0.000000e+00> : vector<8x128xf32>
    %91 = tpu.matmul %81, %11, %cst_35 {dimension_numbers = #tpu.dot_dimension_numbers<[1], [0], [0], [1], [0, 0, 1, 1], [], []>} : vector<8x32xf32>, vector<32x128xf32>, vector<8x128xf32> -> vector<8x128xf32>
    %92 = arith.addf %90, %91 : vector<8x128xf32>
    %93 = vector.extract_strided_slice %92 {offsets = [0, 0], sizes = [8, 32], strides = [1, 1]} : vector<8x128xf32> to vector<8x32xf32>
    %94 = arith.negf %93 : vector<8x32xf32>
    %95 = math.exp %94 : vector<8x32xf32>
    %cst_36 = arith.constant 1.000000e+00 : f32
    %96 = vector.broadcast %cst_36 : f32 to vector<8x32xf32>
    %97 = arith.addf %96, %95 : vector<8x32xf32>
    %98 = arith.divf %96, %97 : vector<8x32xf32>
    %99 = vector.extract_strided_slice %92 {offsets = [0, 32], sizes = [8, 32], strides = [1, 1]} : vector<8x128xf32> to vector<8x32xf32>
    %100 = arith.negf %99 : vector<8x32xf32>
    %101 = math.exp %100 : vector<8x32xf32>
    %cst_37 = arith.constant 1.000000e+00 : f32
    %102 = vector.broadcast %cst_37 : f32 to vector<8x32xf32>
    %103 = arith.addf %102, %101 : vector<8x32xf32>
    %104 = arith.divf %102, %103 : vector<8x32xf32>
    %105 = vector.extract_strided_slice %92 {offsets = [0, 64], sizes = [8, 32], strides = [1, 1]} : vector<8x128xf32> to vector<8x32xf32>
    %106 = math.tanh %105 : vector<8x32xf32>
    %107 = vector.extract_strided_slice %92 {offsets = [0, 96], sizes = [8, 32], strides = [1, 1]} : vector<8x128xf32> to vector<8x32xf32>
    %108 = arith.negf %107 : vector<8x32xf32>
    %109 = math.exp %108 : vector<8x32xf32>
    %cst_38 = arith.constant 1.000000e+00 : f32
    %110 = vector.broadcast %cst_38 : f32 to vector<8x32xf32>
    %111 = arith.addf %110, %109 : vector<8x32xf32>
    %112 = arith.divf %110, %111 : vector<8x32xf32>
    %113 = arith.mulf %104, %79 : vector<8x32xf32>
    %114 = arith.mulf %98, %106 : vector<8x32xf32>
    %115 = arith.addf %113, %114 : vector<8x32xf32>
    %116 = math.tanh %115 : vector<8x32xf32>
    %117 = arith.mulf %112, %116 : vector<8x32xf32>
    %118 = arith.index_cast %86 : i32 to index
    %c0_39 = arith.constant 0 : index
    %c0_40 = arith.constant 0 : index
    %119 = vector.load %arg6[%118, %c0_39, %c0_40] : memref<8x8x32xf32, #tpu.memory_space<vmem>>, vector<1x8x32xf32>
    %120 = vector.shape_cast %119 : vector<1x8x32xf32> to vector<8x32xf32>
    %121 = vector.shape_cast %117 : vector<8x32xf32> to vector<1x8x32xf32>
    tpu.vector_store %arg6[%118, %c0_39, %c0_40], %121 {strides = array<i32>} : memref<8x8x32xf32, #tpu.memory_space<vmem>>, vector<1x8x32xf32>,
    %c3_i32 = arith.constant 3 : i32
    %c7_i32_41 = arith.constant 7 : i32
    %122 = arith.subi %c7_i32_41, %c3_i32 : i32
    %c8_i32_42 = arith.constant 8 : i32
    %123 = arith.muli %122, %c8_i32_42 : i32
    %124 = tpu.assume_multiple %123, 8 : i32
    %125 = arith.index_cast %124 : i32 to index
    %c0_43 = arith.constant 0 : index
    %126 = vector.load %arg9[%125, %c0_43] : memref<64x128xf32, #tpu.memory_space<vmem>>, vector<8x128xf32>
    %cst_44 = arith.constant dense<0.000000e+00> : vector<8x128xf32>
    %127 = tpu.matmul %117, %11, %cst_44 {dimension_numbers = #tpu.dot_dimension_numbers<[1], [0], [0], [1], [0, 0, 1, 1], [], []>} : vector<8x32xf32>, vector<32x128xf32>, vector<8x128xf32> -> vector<8x128xf32>
    %128 = arith.addf %126, %127 : vector<8x128xf32>
    %129 = vector.extract_strided_slice %128 {offsets = [0, 0], sizes = [8, 32], strides = [1, 1]} : vector<8x128xf32> to vector<8x32xf32>
    %130 = arith.negf %129 : vector<8x32xf32>
    %131 = math.exp %130 : vector<8x32xf32>
    %cst_45 = arith.constant 1.000000e+00 : f32
    %132 = vector.broadcast %cst_45 : f32 to vector<8x32xf32>
    %133 = arith.addf %132, %131 : vector<8x32xf32>
    %134 = arith.divf %132, %133 : vector<8x32xf32>
    %135 = vector.extract_strided_slice %128 {offsets = [0, 32], sizes = [8, 32], strides = [1, 1]} : vector<8x128xf32> to vector<8x32xf32>
    %136 = arith.negf %135 : vector<8x32xf32>
    %137 = math.exp %136 : vector<8x32xf32>
    %cst_46 = arith.constant 1.000000e+00 : f32
    %138 = vector.broadcast %cst_46 : f32 to vector<8x32xf32>
    %139 = arith.addf %138, %137 : vector<8x32xf32>
    %140 = arith.divf %138, %139 : vector<8x32xf32>
    %141 = vector.extract_strided_slice %128 {offsets = [0, 64], sizes = [8, 32], strides = [1, 1]} : vector<8x128xf32> to vector<8x32xf32>
    %142 = math.tanh %141 : vector<8x32xf32>
    %143 = vector.extract_strided_slice %128 {offsets = [0, 96], sizes = [8, 32], strides = [1, 1]} : vector<8x128xf32> to vector<8x32xf32>
    %144 = arith.negf %143 : vector<8x32xf32>
    %145 = math.exp %144 : vector<8x32xf32>
    %cst_47 = arith.constant 1.000000e+00 : f32
    %146 = vector.broadcast %cst_47 : f32 to vector<8x32xf32>
    %147 = arith.addf %146, %145 : vector<8x32xf32>
    %148 = arith.divf %146, %147 : vector<8x32xf32>
    %149 = arith.mulf %140, %115 : vector<8x32xf32>
    %150 = arith.mulf %134, %142 : vector<8x32xf32>
    %151 = arith.addf %149, %150 : vector<8x32xf32>
    %152 = math.tanh %151 : vector<8x32xf32>
    %153 = arith.mulf %148, %152 : vector<8x32xf32>
    %154 = arith.index_cast %122 : i32 to index
    %c0_48 = arith.constant 0 : index
    %c0_49 = arith.constant 0 : index
    %155 = vector.load %arg6[%154, %c0_48, %c0_49] : memref<8x8x32xf32, #tpu.memory_space<vmem>>, vector<1x8x32xf32>
    %156 = vector.shape_cast %155 : vector<1x8x32xf32> to vector<8x32xf32>
    %157 = vector.shape_cast %153 : vector<8x32xf32> to vector<1x8x32xf32>
    tpu.vector_store %arg6[%154, %c0_48, %c0_49], %157 {strides = array<i32>} : memref<8x8x32xf32, #tpu.memory_space<vmem>>, vector<1x8x32xf32>,
    %c4_i32 = arith.constant 4 : i32
    %c7_i32_50 = arith.constant 7 : i32
    %158 = arith.subi %c7_i32_50, %c4_i32 : i32
    %c8_i32_51 = arith.constant 8 : i32
    %159 = arith.muli %158, %c8_i32_51 : i32
    %160 = tpu.assume_multiple %159, 8 : i32
    %161 = arith.index_cast %160 : i32 to index
    %c0_52 = arith.constant 0 : index
    %162 = vector.load %arg9[%161, %c0_52] : memref<64x128xf32, #tpu.memory_space<vmem>>, vector<8x128xf32>
    %cst_53 = arith.constant dense<0.000000e+00> : vector<8x128xf32>
    %163 = tpu.matmul %153, %11, %cst_53 {dimension_numbers = #tpu.dot_dimension_numbers<[1], [0], [0], [1], [0, 0, 1, 1], [], []>} : vector<8x32xf32>, vector<32x128xf32>, vector<8x128xf32> -> vector<8x128xf32>
    %164 = arith.addf %162, %163 : vector<8x128xf32>
    %165 = vector.extract_strided_slice %164 {offsets = [0, 0], sizes = [8, 32], strides = [1, 1]} : vector<8x128xf32> to vector<8x32xf32>
    %166 = arith.negf %165 : vector<8x32xf32>
    %167 = math.exp %166 : vector<8x32xf32>
    %cst_54 = arith.constant 1.000000e+00 : f32
    %168 = vector.broadcast %cst_54 : f32 to vector<8x32xf32>
    %169 = arith.addf %168, %167 : vector<8x32xf32>
    %170 = arith.divf %168, %169 : vector<8x32xf32>
    %171 = vector.extract_strided_slice %164 {offsets = [0, 32], sizes = [8, 32], strides = [1, 1]} : vector<8x128xf32> to vector<8x32xf32>
    %172 = arith.negf %171 : vector<8x32xf32>
    %173 = math.exp %172 : vector<8x32xf32>
    %cst_55 = arith.constant 1.000000e+00 : f32
    %174 = vector.broadcast %cst_55 : f32 to vector<8x32xf32>
    %175 = arith.addf %174, %173 : vector<8x32xf32>
    %176 = arith.divf %174, %175 : vector<8x32xf32>
    %177 = vector.extract_strided_slice %164 {offsets = [0, 64], sizes = [8, 32], strides = [1, 1]} : vector<8x128xf32> to vector<8x32xf32>
    %178 = math.tanh %177 : vector<8x32xf32>
    %179 = vector.extract_strided_slice %164 {offsets = [0, 96], sizes = [8, 32], strides = [1, 1]} : vector<8x128xf32> to vector<8x32xf32>
    %180 = arith.negf %179 : vector<8x32xf32>
    %181 = math.exp %180 : vector<8x32xf32>
    %cst_56 = arith.constant 1.000000e+00 : f32
    %182 = vector.broadcast %cst_56 : f32 to vector<8x32xf32>
    %183 = arith.addf %182, %181 : vector<8x32xf32>
    %184 = arith.divf %182, %183 : vector<8x32xf32>
    %185 = arith.mulf %176, %151 : vector<8x32xf32>
    %186 = arith.mulf %170, %178 : vector<8x32xf32>
    %187 = arith.addf %185, %186 : vector<8x32xf32>
    %188 = math.tanh %187 : vector<8x32xf32>
    %189 = arith.mulf %184, %188 : vector<8x32xf32>
    %190 = arith.index_cast %158 : i32 to index
    %c0_57 = arith.constant 0 : index
    %c0_58 = arith.constant 0 : index
    %191 = vector.load %arg6[%190, %c0_57, %c0_58] : memref<8x8x32xf32, #tpu.memory_space<vmem>>, vector<1x8x32xf32>
    %192 = vector.shape_cast %191 : vector<1x8x32xf32> to vector<8x32xf32>
    %193 = vector.shape_cast %189 : vector<8x32xf32> to vector<1x8x32xf32>
    tpu.vector_store %arg6[%190, %c0_57, %c0_58], %193 {strides = array<i32>} : memref<8x8x32xf32, #tpu.memory_space<vmem>>, vector<1x8x32xf32>,
    %c5_i32 = arith.constant 5 : i32
    %c7_i32_59 = arith.constant 7 : i32
    %194 = arith.subi %c7_i32_59, %c5_i32 : i32
    %c8_i32_60 = arith.constant 8 : i32
    %195 = arith.muli %194, %c8_i32_60 : i32
    %196 = tpu.assume_multiple %195, 8 : i32
    %197 = arith.index_cast %196 : i32 to index
    %c0_61 = arith.constant 0 : index
    %198 = vector.load %arg9[%197, %c0_61] : memref<64x128xf32, #tpu.memory_space<vmem>>, vector<8x128xf32>
    %cst_62 = arith.constant dense<0.000000e+00> : vector<8x128xf32>
    %199 = tpu.matmul %189, %11, %cst_62 {dimension_numbers = #tpu.dot_dimension_numbers<[1], [0], [0], [1], [0, 0, 1, 1], [], []>} : vector<8x32xf32>, vector<32x128xf32>, vector<8x128xf32> -> vector<8x128xf32>
    %200 = arith.addf %198, %199 : vector<8x128xf32>
    %201 = vector.extract_strided_slice %200 {offsets = [0, 0], sizes = [8, 32], strides = [1, 1]} : vector<8x128xf32> to vector<8x32xf32>
    %202 = arith.negf %201 : vector<8x32xf32>
    %203 = math.exp %202 : vector<8x32xf32>
    %cst_63 = arith.constant 1.000000e+00 : f32
    %204 = vector.broadcast %cst_63 : f32 to vector<8x32xf32>
    %205 = arith.addf %204, %203 : vector<8x32xf32>
    %206 = arith.divf %204, %205 : vector<8x32xf32>
    %207 = vector.extract_strided_slice %200 {offsets = [0, 32], sizes = [8, 32], strides = [1, 1]} : vector<8x128xf32> to vector<8x32xf32>
    %208 = arith.negf %207 : vector<8x32xf32>
    %209 = math.exp %208 : vector<8x32xf32>
    %cst_64 = arith.constant 1.000000e+00 : f32
    %210 = vector.broadcast %cst_64 : f32 to vector<8x32xf32>
    %211 = arith.addf %210, %209 : vector<8x32xf32>
    %212 = arith.divf %210, %211 : vector<8x32xf32>
    %213 = vector.extract_strided_slice %200 {offsets = [0, 64], sizes = [8, 32], strides = [1, 1]} : vector<8x128xf32> to vector<8x32xf32>
    %214 = math.tanh %213 : vector<8x32xf32>
    %215 = vector.extract_strided_slice %200 {offsets = [0, 96], sizes = [8, 32], strides = [1, 1]} : vector<8x128xf32> to vector<8x32xf32>
    %216 = arith.negf %215 : vector<8x32xf32>
    %217 = math.exp %216 : vector<8x32xf32>
    %cst_65 = arith.constant 1.000000e+00 : f32
    %218 = vector.broadcast %cst_65 : f32 to vector<8x32xf32>
    %219 = arith.addf %218, %217 : vector<8x32xf32>
    %220 = arith.divf %218, %219 : vector<8x32xf32>
    %221 = arith.mulf %212, %187 : vector<8x32xf32>
    %222 = arith.mulf %206, %214 : vector<8x32xf32>
    %223 = arith.addf %221, %222 : vector<8x32xf32>
    %224 = math.tanh %223 : vector<8x32xf32>
    %225 = arith.mulf %220, %224 : vector<8x32xf32>
    %226 = arith.index_cast %194 : i32 to index
    %c0_66 = arith.constant 0 : index
    %c0_67 = arith.constant 0 : index
    %227 = vector.load %arg6[%226, %c0_66, %c0_67] : memref<8x8x32xf32, #tpu.memory_space<vmem>>, vector<1x8x32xf32>
    %228 = vector.shape_cast %227 : vector<1x8x32xf32> to vector<8x32xf32>
    %229 = vector.shape_cast %225 : vector<8x32xf32> to vector<1x8x32xf32>
    tpu.vector_store %arg6[%226, %c0_66, %c0_67], %229 {strides = array<i32>} : memref<8x8x32xf32, #tpu.memory_space<vmem>>, vector<1x8x32xf32>,
    %c6_i32 = arith.constant 6 : i32
    %c7_i32_68 = arith.constant 7 : i32
    %230 = arith.subi %c7_i32_68, %c6_i32 : i32
    %c8_i32_69 = arith.constant 8 : i32
    %231 = arith.muli %230, %c8_i32_69 : i32
    %232 = tpu.assume_multiple %231, 8 : i32
    %233 = arith.index_cast %232 : i32 to index
    %c0_70 = arith.constant 0 : index
    %234 = vector.load %arg9[%233, %c0_70] : memref<64x128xf32, #tpu.memory_space<vmem>>, vector<8x128xf32>
    %cst_71 = arith.constant dense<0.000000e+00> : vector<8x128xf32>
    %235 = tpu.matmul %225, %11, %cst_71 {dimension_numbers = #tpu.dot_dimension_numbers<[1], [0], [0], [1], [0, 0, 1, 1], [], []>} : vector<8x32xf32>, vector<32x128xf32>, vector<8x128xf32> -> vector<8x128xf32>
    %236 = arith.addf %234, %235 : vector<8x128xf32>
    %237 = vector.extract_strided_slice %236 {offsets = [0, 0], sizes = [8, 32], strides = [1, 1]} : vector<8x128xf32> to vector<8x32xf32>
    %238 = arith.negf %237 : vector<8x32xf32>
    %239 = math.exp %238 : vector<8x32xf32>
    %cst_72 = arith.constant 1.000000e+00 : f32
    %240 = vector.broadcast %cst_72 : f32 to vector<8x32xf32>
    %241 = arith.addf %240, %239 : vector<8x32xf32>
    %242 = arith.divf %240, %241 : vector<8x32xf32>
    %243 = vector.extract_strided_slice %236 {offsets = [0, 32], sizes = [8, 32], strides = [1, 1]} : vector<8x128xf32> to vector<8x32xf32>
    %244 = arith.negf %243 : vector<8x32xf32>
    %245 = math.exp %244 : vector<8x32xf32>
    %cst_73 = arith.constant 1.000000e+00 : f32
    %246 = vector.broadcast %cst_73 : f32 to vector<8x32xf32>
    %247 = arith.addf %246, %245 : vector<8x32xf32>
    %248 = arith.divf %246, %247 : vector<8x32xf32>
    %249 = vector.extract_strided_slice %236 {offsets = [0, 64], sizes = [8, 32], strides = [1, 1]} : vector<8x128xf32> to vector<8x32xf32>
    %250 = math.tanh %249 : vector<8x32xf32>
    %251 = vector.extract_strided_slice %236 {offsets = [0, 96], sizes = [8, 32], strides = [1, 1]} : vector<8x128xf32> to vector<8x32xf32>
    %252 = arith.negf %251 : vector<8x32xf32>
    %253 = math.exp %252 : vector<8x32xf32>
    %cst_74 = arith.constant 1.000000e+00 : f32
    %254 = vector.broadcast %cst_74 : f32 to vector<8x32xf32>
    %255 = arith.addf %254, %253 : vector<8x32xf32>
    %256 = arith.divf %254, %255 : vector<8x32xf32>
    %257 = arith.mulf %248, %223 : vector<8x32xf32>
    %258 = arith.mulf %242, %250 : vector<8x32xf32>
    %259 = arith.addf %257, %258 : vector<8x32xf32>
    %260 = math.tanh %259 : vector<8x32xf32>
    %261 = arith.mulf %256, %260 : vector<8x32xf32>
    %262 = arith.index_cast %230 : i32 to index
    %c0_75 = arith.constant 0 : index
    %c0_76 = arith.constant 0 : index
    %263 = vector.load %arg6[%262, %c0_75, %c0_76] : memref<8x8x32xf32, #tpu.memory_space<vmem>>, vector<1x8x32xf32>
    %264 = vector.shape_cast %263 : vector<1x8x32xf32> to vector<8x32xf32>
    %265 = vector.shape_cast %261 : vector<8x32xf32> to vector<1x8x32xf32>
    tpu.vector_store %arg6[%262, %c0_75, %c0_76], %265 {strides = array<i32>} : memref<8x8x32xf32, #tpu.memory_space<vmem>>, vector<1x8x32xf32>,
    %c7_i32_77 = arith.constant 7 : i32
    %c7_i32_78 = arith.constant 7 : i32
    %266 = arith.subi %c7_i32_78, %c7_i32_77 : i32
    %c8_i32_79 = arith.constant 8 : i32
    %267 = arith.muli %266, %c8_i32_79 : i32
    %268 = tpu.assume_multiple %267, 8 : i32
    %269 = arith.index_cast %268 : i32 to index
    %c0_80 = arith.constant 0 : index
    %270 = vector.load %arg9[%269, %c0_80] : memref<64x128xf32, #tpu.memory_space<vmem>>, vector<8x128xf32>
    %cst_81 = arith.constant dense<0.000000e+00> : vector<8x128xf32>
    %271 = tpu.matmul %261, %11, %cst_81 {dimension_numbers = #tpu.dot_dimension_numbers<[1], [0], [0], [1], [0, 0, 1, 1], [], []>} : vector<8x32xf32>, vector<32x128xf32>, vector<8x128xf32> -> vector<8x128xf32>
    %272 = arith.addf %270, %271 : vector<8x128xf32>
    %273 = vector.extract_strided_slice %272 {offsets = [0, 0], sizes = [8, 32], strides = [1, 1]} : vector<8x128xf32> to vector<8x32xf32>
    %274 = arith.negf %273 : vector<8x32xf32>
    %275 = math.exp %274 : vector<8x32xf32>
    %cst_82 = arith.constant 1.000000e+00 : f32
    %276 = vector.broadcast %cst_82 : f32 to vector<8x32xf32>
    %277 = arith.addf %276, %275 : vector<8x32xf32>
    %278 = arith.divf %276, %277 : vector<8x32xf32>
    %279 = vector.extract_strided_slice %272 {offsets = [0, 32], sizes = [8, 32], strides = [1, 1]} : vector<8x128xf32> to vector<8x32xf32>
    %280 = arith.negf %279 : vector<8x32xf32>
    %281 = math.exp %280 : vector<8x32xf32>
    %cst_83 = arith.constant 1.000000e+00 : f32
    %282 = vector.broadcast %cst_83 : f32 to vector<8x32xf32>
    %283 = arith.addf %282, %281 : vector<8x32xf32>
    %284 = arith.divf %282, %283 : vector<8x32xf32>
    %285 = vector.extract_strided_slice %272 {offsets = [0, 64], sizes = [8, 32], strides = [1, 1]} : vector<8x128xf32> to vector<8x32xf32>
    %286 = math.tanh %285 : vector<8x32xf32>
    %287 = vector.extract_strided_slice %272 {offsets = [0, 96], sizes = [8, 32], strides = [1, 1]} : vector<8x128xf32> to vector<8x32xf32>
    %288 = arith.negf %287 : vector<8x32xf32>
    %289 = math.exp %288 : vector<8x32xf32>
    %cst_84 = arith.constant 1.000000e+00 : f32
    %290 = vector.broadcast %cst_84 : f32 to vector<8x32xf32>
    %291 = arith.addf %290, %289 : vector<8x32xf32>
    %292 = arith.divf %290, %291 : vector<8x32xf32>
    %293 = arith.mulf %284, %259 : vector<8x32xf32>
    %294 = arith.mulf %278, %286 : vector<8x32xf32>
    %295 = arith.addf %293, %294 : vector<8x32xf32>
    %296 = math.tanh %295 : vector<8x32xf32>
    %297 = arith.mulf %292, %296 : vector<8x32xf32>
    %298 = arith.index_cast %266 : i32 to index
    %c0_85 = arith.constant 0 : index
    %c0_86 = arith.constant 0 : index
    %299 = vector.load %arg6[%298, %c0_85, %c0_86] : memref<8x8x32xf32, #tpu.memory_space<vmem>>, vector<1x8x32xf32>
    %300 = vector.shape_cast %299 : vector<1x8x32xf32> to vector<8x32xf32>
    %301 = vector.shape_cast %297 : vector<8x32xf32> to vector<1x8x32xf32>
    tpu.vector_store %arg6[%298, %c0_85, %c0_86], %301 {strides = array<i32>} : memref<8x8x32xf32, #tpu.memory_space<vmem>>, vector<1x8x32xf32>,
    %c8_i32_87 = arith.constant 8 : i32
    %c0_88 = arith.constant 0 : index
    %c0_89 = arith.constant 0 : index
    %302 = vector.load %arg7[%c0_88, %c0_89] : memref<8x32xf32, #tpu.memory_space<vmem>>, vector<8x32xf32>
    tpu.vector_store %arg7[%c0_88, %c0_89], %297 {strides = array<i32>} : memref<8x32xf32, #tpu.memory_space<vmem>>, vector<8x32xf32>,
    %c0_90 = arith.constant 0 : index
    %c0_91 = arith.constant 0 : index
    %303 = vector.load %arg8[%c0_90, %c0_91] : memref<8x32xf32, #tpu.memory_space<vmem>>, vector<8x32xf32>
    tpu.vector_store %arg8[%c0_90, %c0_91], %295 {strides = array<i32>} : memref<8x32xf32, #tpu.memory_space<vmem>>, vector<8x32xf32>,
    return
  }
  func.func @transform_0(%arg0: i32, %arg1: i32) -> (i32, i32, i32) {
    %c0_i32 = arith.constant 0 : i32
    %0 = arith.subi %c0_i32, %arg1 : i32
    %c0_i32_0 = arith.constant 0 : i32
    %c0_i32_1 = arith.constant 0 : i32
    return %0, %arg0, %c0_i32_0 : i32, i32, i32
  }
  func.func @transform_1(%arg0: i32, %arg1: i32) -> (i32, i32) {
    %c0_i32 = arith.constant 0 : i32
    %c0_i32_0 = arith.constant 0 : i32
    %c0_i32_1 = arith.constant 0 : i32
    return %c0_i32, %c0_i32_0 : i32, i32
  }
  func.func @transform_2(%arg0: i32, %arg1: i32) -> (i32, i32) {
    %c0_i32 = arith.constant 0 : i32
    %c0_i32_0 = arith.constant 0 : i32
    %c0_i32_1 = arith.constant 0 : i32
    return %c0_i32, %c0_i32_0 : i32, i32
  }
  func.func @transform_3(%arg0: i32, %arg1: i32) -> (i32, i32) {
    %c0_i32 = arith.constant 0 : i32
    %c0_i32_0 = arith.constant 0 : i32
    %c0_i32_1 = arith.constant 0 : i32
    return %c0_i32, %c0_i32_0 : i32, i32
  }
  func.func @transform_4(%arg0: i32, %arg1: i32) -> (i32, i32, i32) {
    %c0_i32 = arith.constant 0 : i32
    %0 = arith.subi %c0_i32, %arg1 : i32
    %c0_i32_0 = arith.constant 0 : i32
    %c0_i32_1 = arith.constant 0 : i32
    return %0, %arg0, %c0_i32_0 : i32, i32, i32
  }
}

</mosaic_0001>

<bundles_post_ra>
// kernel: tpu_custom_call.1
= control target key start
LH: loop header
LB: loop body
LE: loop exit
PB: predicated region body
PF: predicated region fallthrough
CT: control target
= control target key end

     0   :  { %9 = vsyncpa [#allocation6], 0  ;;  %s1752_s0 = inlined_call_operand.hbm [shape: f32[8,8,16], index: 0, kind: input, shape index: {}]   ;;  %s1753_s1 = inlined_call_operand.hbm [shape: f32[16,128], index: 1, kind: input, shape index: {}]   ;;  %s1754_s2 = inlined_call_operand.hbm [shape: f32[32,128], index: 2, kind: input, shape index: {}]   ;;  %s1755_s3 = inlined_call_operand.vmem [shape: f32[1,128], index: 3, kind: input, shape index: {}]   ;;  %s1756_s4 = inlined_call_operand.hbm [shape: f32[8,8,32], index: 4, kind: output, shape index: {}]  }
   0x1   :  { %10 = vsyncpa [#allocation9], 0 }
   0x2   :  { %11 = vsyncpa [#allocation7], 0  ;;  %s1512_s15 = smov [#allocation8]   ;;  %s1513_s17 = smov [#allocation5]  }
   0x3   :  { %s33_s16 = sshll.u32 %s1512_s15, 4  ;;  %s21_s18 = sshll.u32 %s1513_s17, 4  ;;  %s34_s16 = int_to_ptr.vmem [resolvable:$true] %s33_s16  ;;  %s1549_s18 = int_to_ptr.vmem [resolvable:$true] %s21_s18 }
   0x4   :  { %s1418_s21 = scalar_lea.hbm %s1753_s1, 256 }
   0x5   :  { %p1419_p0 = scmp.ne.s32.totalorder %s1753_s1, %s1418_s21  ;;  %p1422_p1 = scmp.lt.u32.totalorder %s1418_s21, %s1753_s1 }
   0x7   :  { %p1424_p2 = pnand %p1422_p1, %p1419_p0 }
   0x9   :  { %1427 = shalt.err (!%p1424_p2)
}
   0xa   :  { %s1428_s26 = scalar_lea.vmem %s34_s16, 256  ;;  %p1433_p4 = scmp.lt.s32.totalorder %s34_s16, %s34_s16 }
   0xb   :  { %p1429_p3 = scmp.ne.s32.totalorder %s34_s16, %s1428_s26  ;;  %p1434_p5 = scmp.lt.s32.totalorder %s1428_s26, %s1428_s26 }
   0xd   :  { %p1435_p6 = por %p1434_p5, %p1433_p4 }
   0xf   :  { %p1436_p7 = pnand %p1435_p6, %p1429_p3 }
  0x11   :  { %1439 = shalt.err (!%p1436_p7)
}
  0x12   :  { %s1514_s27 = smov 128   ;;  %s1515_s28 = smov 8  }
  0x13   :  { %39 = dma.hbm_to_vmem [thread:$0]  %s1753_s1, 256, %s34_s16, [#allocation9], %s1514_s27, %s1514_s27, %s1515_s28  }
  0x14   :  { %s1440_s7 = scalar_lea.hbm %s1752_s0, 1024 }
  0x15   :  { %p1441_p8 = scmp.ne.s32.totalorder %s1752_s0, %s1440_s7  ;;  %p1444_p9 = scmp.lt.u32.totalorder %s1440_s7, %s1752_s0 }
  0x17   :  { %p1446_p10 = pnand %p1444_p9, %p1441_p8 }
  0x19   :  { %1449 = shalt.err (!%p1446_p10)
}
  0x1a   :  { %s1450_s12 = scalar_lea.vmem %s1549_s18, 1024  ;;  %p1455_p12 = scmp.lt.s32.totalorder %s1549_s18, %s1549_s18 }
  0x1b   :  { %p1451_p11 = scmp.ne.s32.totalorder %s1549_s18, %s1450_s12  ;;  %p1456_p13 = scmp.lt.s32.totalorder %s1450_s12, %s1450_s12 }
  0x1d   :  { %p1457_p0 = por %p1456_p13, %p1455_p12 }
  0x1f   :  { %p1458_p1 = pnand %p1457_p0, %p1451_p11 }
  0x21   :  { %1461 = shalt.err (!%p1458_p1)
}
  0x22   :  { %27 = dma.hbm_to_vmem [thread:$0]  %s1752_s0, 1024, %s1549_s18, [#allocation6], %s1514_s27, %s1514_s27, %s1515_s28  }
  0x23   :  { %s1516_s14 = smov [#allocation10]   ;;  %s1462_s19 = scalar_lea.hbm %s1754_s2, 512 }
  0x24   :  { %s45_s15 = sshll.u32 %s1516_s14, 4  ;;  %p1463_p2 = scmp.ne.s32.totalorder %s1754_s2, %s1462_s19  ;;  %s46_s15 = int_to_ptr.vmem [resolvable:$true] %s45_s15 }
  0x25   :  { %p1466_p3 = scmp.lt.u32.totalorder %s1462_s19, %s1754_s2 }
  0x27   :  { %p1468_p4 = pnand %p1466_p3, %p1463_p2 }
  0x29   :  { %1471 = shalt.err (!%p1468_p4)
}
  0x2a   :  { %s1472_s24 = scalar_lea.vmem %s46_s15, 512  ;;  %p1477_p6 = scmp.lt.s32.totalorder %s46_s15, %s46_s15 }
  0x2b   :  { %p1473_p5 = scmp.ne.s32.totalorder %s46_s15, %s1472_s24  ;;  %p1478_p7 = scmp.lt.s32.totalorder %s1472_s24, %s1472_s24 }
  0x2d   :  { %p1479_p8 = por %p1478_p7, %p1477_p6 }
  0x2f   :  { %p1480_p9 = pnand %p1479_p8, %p1473_p5 }
  0x31   :  { %1483 = shalt.err (!%p1480_p9)
}
  0x32   :  { %51 = dma.hbm_to_vmem [thread:$0]  %s1754_s2, 512, %s46_s15, [#allocation9], %s1514_s27, %s1514_s27, %s1515_s28  }
  0x33   :  { %1506 = dma.done.wait [#allocation6], 1024  }
  0x34   :  { %1507 = vsyncadd [#allocation6], 4294966272 }
  0x35   :  { %1508 = dma.done.wait [#allocation9], 768  }
  0x36   :  { %1509 = vsyncadd [#allocation9], 4294966528  ;;  %v1517_v0 = vmov 0.0|0.0   ;;  %vm1518_vm0 = vmmov 0   ;;  %v1519_v1 = vmov 0.0   ;;  %vm71_vm1 = vcmask 261120  }
  0x37   :  { %1294 = vmatprep.subr.bf16.mxu1 %v1517_v0  ;;  %1210 = vmatprep.mubr.msk.f32.mxu1 %vm1518_vm0, %v1519_v1  ;;  %72 = vst.msk [vmem:[#allocation2] sm:$0xff] %vm71_vm1, %v1519_v1  ;;  %73 = vst.msk [vmem:[#allocation3] sm:$0xff] %vm71_vm1, %v1519_v1  ;;  %vm91_vm2 = vcmask 130048   ;;  %v82_v2 = vld [vmem:[#allocation8] sm:$0xff]  ;;  %v83_v3 = vld [vmem:[#allocation8 + $0x8] sm:$0xff]  ;;  %s1521_s26 = smov 32  }
  0x38   :  { %v74_v4 = vld [vmem:[#allocation5] sm:$0xff]  ;;  %v1290_v5 = vpack.c.bf16 %v83_v3, %v82_v2  ;;  %v229_v6 = vld [vmem:[#allocation10] sm:$0xff]  ;;  %v230_v7 = vld [vmem:[#allocation10 + $0x8] sm:$0xff]  ;;  %s1522_s29 = smov 96   ;;  %s1523_s30 = smov [#allocation11]  }
  0x39   :  { %1190 = vmatprep.mubr.msk.f32.mxu0 %vm91_vm2, %v74_v4  ;;  %v1609_v8 = vpack.c.bf16 %v230_v7, %v229_v6  ;;  %v231_v9 = vld [vmem:[#allocation10 + $0x10] sm:$0xff]  ;;  %v232_v10 = vld [vmem:[#allocation10 + $0x18] sm:$0xff]  ;;  %v76_v12 = vld [vmem:[#allocation5 + $0x10] sm:$0xff]  ;;  %s1094_s5 = sshll.u32 %s1523_s30, 4  ;;  %s1095_s5 = int_to_ptr.vmem [resolvable:$true] %s1094_s5 }
  0x3a   :  { %1291 = vmatprep.subr.bf16.mxu0 %v1290_v5  ;;  %v75_v11 = vld [vmem:[#allocation5 + $0x8] sm:$0xff]  ;;  %v1612_v13 = vpack.c.bf16 %v232_v10, %v231_v9  ;;  %v77_v14 = vld [vmem:[#allocation5 + $0x18] sm:$0xff]  ;;  %v78_v15 = vld [vmem:[#allocation5 + $0x20] sm:$0xff]  ;;  %s1484_s6 = scalar_lea.vmem %s1095_s5, 1024  ;;  %p1489_p11 = scmp.lt.s32.totalorder %s1095_s5, %s1095_s5 }
  0x3b   :  { %1293 = vmatpush3.bf16.msra.mxu0 %v1290_v5  ;;  %1296 = vmatpush3.bf16.msra.mxu1 %v1609_v8  ;;  %v79_v17 = vld [vmem:[#allocation5 + $0x28] sm:$0xff]  ;;  %v80_v18 = vld [vmem:[#allocation5 + $0x30] sm:$0xff]  ;;  %v81_v19 = vld [vmem:[#allocation5 + $0x38] sm:$0xff]  ;;  %p1485_p10 = scmp.ne.s32.totalorder %s1095_s5, %s1484_s6  ;;  %p1490_p12 = scmp.lt.s32.totalorder %s1484_s6, %s1484_s6 }
  0x3c   :  { %1306 = vmatprep.subr.bf16.mxu0 %v1517_v0  ;;  %1297 = vmatprep.subr.bf16.mxu1 %v1517_v0  ;;  %v1111_v20 = vld [vmem:[%s1755_s3] ss:$0 sm:$0xff]  ;;  %s1520_s3 = smov 64  }
  0x3d   :  { %p1491_p13 = por %p1490_p12, %p1489_p11 }
  0x3e   :  { %1191 = vmatmul.mubr.msk.f32.vlgmr.msra.gmra.mrb[0].mxu0 %vm91_vm2, %v75_v11  ;;  %v233_v16 = vld [vmem:[#allocation2] sm:$0xff]  ;;  %v234_v41 = vld [vmem:[#allocation3] sm:$0xff] }
  0x3f   :  { %1193 = vmatprep.mubr.msk.f32.mxu0 %vm91_vm2, %v76_v12  ;;  %1308 = vmatpush3.bf16.msra.mxu0 %v1609_v8  ;;  %p1492_p0 = pnand %p1491_p13, %p1485_p10 }
  0x40   :  { %1299 = vmatpush3.bf16.msra.mxu1 %v1612_v13  ;;  %1309 = vmatprep.subr.bf16.mxu0 %v1517_v0 }
  0x41   :  { %1300 = vmatprep.subr.bf16.mxu1 %v1517_v0 }
  0x42   :  { %1194 = vmatmul.mubr.msk.f32.gmra.mrb[2].mxu0 %vm91_vm2, %v77_v14 }
  0x43   :  { %1196 = vmatprep.mubr.msk.f32.mxu0 %vm91_vm2, %v78_v15  ;;  %1211 = vmatmul.mubr.msk.f32.vlgmr.msra.gmra.mrb[0].mxu1 %vm71_vm1, %v233_v16 }
  0x44   :  { %1302 = vmatpush3.bf16.msra.mxu1 %v1609_v8  ;;  %1221 = vmatprep.mubr.msk.f32.mxu1 %vm1518_vm0, %v1519_v1 }
  0x45   :  { %1303 = vmatprep.subr.bf16.mxu1 %v1517_v0  ;;  %1311 = vmatpush3.bf16.msra.mxu0 %v1612_v13 }
  0x46   :  { %1197 = vmatmul.mubr.msk.f32.gmra.mrb[4].mxu0 %vm91_vm2, %v79_v17  ;;  %1318 = vmatprep.subr.bf16.mxu0 %v1517_v0 }
  0x47   :  { %1199 = vmatprep.mubr.msk.f32.mxu0 %vm91_vm2, %v80_v18 }
  0x48   :  { %1305 = vmatpush3.bf16.msra.mxu1 %v1612_v13 }
  0x49   :  { %1312 = vmatprep.subr.bf16.mxu1 %v1517_v0 }
  0x4a   :  { %1200 = vmatmul.mubr.msk.f32.gmra.mrb[6].mxu0 %vm91_vm2, %v81_v19 }
  0x4b   :  { %1232 = vmatprep.mubr.msk.f32.mxu0 %vm1518_vm0, %v1519_v1 }
 0x111   :  { %v1192_v21 = vpop.f32.mrb[0].mxu0 }
 0x112   :  { %v1641_v22 = vadd.f32 %v1192_v21, %v1111_v20  ;;  %v182_v23 = vpop.f32.mrb[1].mxu0 }
 0x113   :  { %v1643_v24 = vadd.f32 %v1111_v20, %v182_v23 }
 0x115   :  { %v1195_v25 = vpop.f32.mrb[2].mxu0 }
 0x116   :  { %v1645_v26 = vadd.f32 %v1195_v25, %v1111_v20  ;;  %v192_v27 = vpop.f32.mrb[3].mxu0  ;;  %v307_v28 = vpop.f32.mrb[0].mxu1 }
 0x117   :  { %v1647_v29 = vadd.f32 %v1111_v20, %v192_v27  ;;  %v1212_v30 = vpop.f32.mrb[1].mxu1 }
 0x119   :  { %v1198_v31 = vpop.f32.mrb[4].mxu0 }
 0x11a   :  { %v1649_v32 = vadd.f32 %v1198_v31, %v1111_v20  ;;  %v202_v33 = vpop.f32.mrb[5].mxu0 }
 0x11b   :  { %v1651_v34 = vadd.f32 %v1111_v20, %v202_v33 }
 0x11d   :  { %v1201_v35 = vpop.f32.mrb[6].mxu0 }
 0x11e   :  { %v218_v36 = vadd.f32 %v1201_v35, %v1111_v20  ;;  %v212_v37 = vpop.f32.mrb[7].mxu0 }
 0x11f   :  { %v213_v38 = vadd.f32 %v1111_v20, %v212_v37 }
 0x120   :  { %v311_v39 = vadd.f32 %v307_v28, %v218_v36 }
 0x122   :  { %1354 = vtanh.f32 %v311_v39  ;;  %v1121_v42 = vmul.f32 -1.442695, %v311_v39 }
 0x124   :  { %1356 = vpow2.f32 %v1121_v42 }
 0x12c   :  { %v1355_v40 = vpop.eup %1354 }
 0x12d   :  { %325 = vrot.lane.b32.xlu0 %v1355_v40, %s1520_s3 }
 0x12e   :  { %v1357_v43 = vpop.eup %1356 }
 0x12f   :  { %v315_v44 = vadd.f32 1.0, %v1357_v43 }
 0x131   :  { %320 = vrot.lane.b32.xlu0 %v234_v41, %s1521_s26  ;;  %1358 = vrcp.f32 %v315_v44 }
 0x13b   :  { %v1359_v45 = vpop.eup %1358 }
 0x19f   :  { %v326_v46 = vpop.permute.xlu0 %325 }
 0x1a0   :  { %v328_v47 = vmul.f32 %v1359_v45, %v326_v46 }
 0x1a2   :  { %330 = vrot.lane.b32.xlu1 %v328_v47, %s1521_s26 }
 0x1a3   :  { %v321_v48 = vpop.permute.xlu0 %320 }
 0x1a4   :  { %v323_v49 = vmul.f32 %v1359_v45, %v321_v48 }
 0x214   :  { %v331_v50 = vpop.permute.xlu1 %330 }
 0x215   :  { %v333_v51 = vadd.f32 %v331_v50, %v323_v49 }
 0x217   :  { %1360 = vtanh.f32 %v333_v51 }
 0x221   :  { %v1361_v52 = vpop.eup %1360 }
 0x222   :  { %336 = vrot.lane.b32.xlu1 %v1361_v52, %s1520_s3 }
 0x294   :  { %v337_v53 = vpop.permute.xlu1 %336 }
 0x295   :  { %v339_v54 = vmul.f32 %v1359_v45, %v337_v53 }
 0x297   :  { %341 = vrot.lane.b32.xlu0 %v339_v54, %s1521_s26 }
 0x309   :  { %v342_v55 = vpop.permute.xlu0 %341 }
 0x30a   :  { %345 = vst.msk [vmem:[#allocation11 + $0x38] sm:$0xff] %vm71_vm1, %v342_v55  ;;  %1222 = vmatmul.mubr.msk.f32.vlgmr.msra.gmra.mrb[2].mxu1 %vm71_vm1, %v342_v55 }
 0x30b   :  { %1314 = vmatpush3.bf16.msra.mxu1 %v1609_v8  ;;  %1243 = vmatprep.mubr.msk.f32.mxu1 %vm1518_vm0, %v1519_v1 }
 0x30c   :  { %1315 = vmatprep.subr.bf16.mxu1 %v1517_v0 }
 0x30f   :  { %1317 = vmatpush3.bf16.msra.mxu1 %v1612_v13 }
 0x310   :  { %1324 = vmatprep.subr.bf16.mxu1 %v1517_v0 }
 0x3dd   :  { %v416_v56 = vpop.f32.mrb[2].mxu1 }
 0x3de   :  { %v420_v57 = vadd.f32 %v416_v56, %v213_v38  ;;  %v1223_v58 = vpop.f32.mrb[3].mxu1 }
 0x3e0   :  { %1362 = vtanh.f32 %v420_v57  ;;  %v1123_v60 = vmul.f32 -1.442695, %v420_v57 }
 0x3e2   :  { %1364 = vpow2.f32 %v1123_v60 }
 0x3ea   :  { %v1363_v59 = vpop.eup %1362 }
 0x3eb   :  { %430 = vrot.lane.b32.xlu1 %v1363_v59, %s1520_s3 }
 0x3ec   :  { %v1365_v61 = vpop.eup %1364 }
 0x3ed   :  { %v424_v62 = vadd.f32 1.0, %v1365_v61 }
 0x3ef   :  { %1366 = vrcp.f32 %v424_v62 }
 0x3f9   :  { %v1367_v63 = vpop.eup %1366 }
 0x3fa   :  { %v428_v4 = vmul.f32 %v1367_v63, %v333_v51 }
 0x45d   :  { %v431_v2 = vpop.permute.xlu1 %430 }
 0x45e   :  { %v433_v3 = vmul.f32 %v1367_v63, %v431_v2 }
 0x460   :  { %435 = vrot.lane.b32.xlu0 %v433_v3, %s1521_s26 }
 0x4d2   :  { %v436_v5 = vpop.permute.xlu0 %435 }
 0x4d3   :  { %v438_v6 = vadd.f32 %v436_v5, %v428_v4 }
 0x4d5   :  { %1368 = vtanh.f32 %v438_v6 }
 0x4df   :  { %v1369_v7 = vpop.eup %1368 }
 0x4e0   :  { %441 = vrot.lane.b32.xlu1 %v1369_v7, %s1520_s3 }
 0x552   :  { %v442_v9 = vpop.permute.xlu1 %441 }
 0x553   :  { %v444_v10 = vmul.f32 %v1367_v63, %v442_v9 }
 0x555   :  { %446 = vrot.lane.b32.xlu0 %v444_v10, %s1521_s26 }
 0x5c7   :  { %v447_v11 = vpop.permute.xlu0 %446 }
 0x5c8   :  { %450 = vst.msk [vmem:[#allocation11 + $0x30] sm:$0xff] %vm71_vm1, %v447_v11  ;;  %1233 = vmatmul.mubr.msk.f32.vlgmr.msra.gmra.mrb[8].mxu0 %vm71_vm1, %v447_v11 }
 0x5c9   :  { %1320 = vmatpush3.bf16.msra.mxu0 %v1609_v8  ;;  %1254 = vmatprep.mubr.msk.f32.mxu0 %vm1518_vm0, %v1519_v1 }
 0x5ca   :  { %1321 = vmatprep.subr.bf16.mxu0 %v1517_v0 }
 0x5cd   :  { %1323 = vmatpush3.bf16.msra.mxu0 %v1612_v13 }
 0x5ce   :  { %1330 = vmatprep.subr.bf16.mxu0 %v1517_v0 }
 0x69b   :  { %v521_v12 = vpop.f32.mrb[8].mxu0 }
 0x69c   :  { %v525_v14 = vadd.f32 %v521_v12, %v1649_v32  ;;  %v1234_v15 = vpop.f32.mrb[9].mxu0 }
 0x69e   :  { %1370 = vtanh.f32 %v525_v14  ;;  %v1125_v17 = vmul.f32 -1.442695, %v525_v14 }
 0x6a0   :  { %1372 = vpow2.f32 %v1125_v17 }
 0x6a8   :  { %v1371_v16 = vpop.eup %1370 }
 0x6a9   :  { %535 = vrot.lane.b32.xlu1 %v1371_v16, %s1520_s3 }
 0x6aa   :  { %v1373_v18 = vpop.eup %1372 }
 0x6ab   :  { %v529_v19 = vadd.f32 1.0, %v1373_v18 }
 0x6ad   :  { %1374 = vrcp.f32 %v529_v19 }
 0x6b7   :  { %v1375_v20 = vpop.eup %1374 }
 0x6b8   :  { %v533_v25 = vmul.f32 %v1375_v20, %v438_v6 }
 0x71b   :  { %v536_v21 = vpop.permute.xlu1 %535 }
 0x71c   :  { %v538_v23 = vmul.f32 %v1375_v20, %v536_v21 }
 0x71e   :  { %540 = vrot.lane.b32.xlu0 %v538_v23, %s1521_s26 }
 0x790   :  { %v541_v27 = vpop.permute.xlu0 %540 }
 0x791   :  { %v543_v28 = vadd.f32 %v541_v27, %v533_v25 }
 0x793   :  { %1376 = vtanh.f32 %v543_v28 }
 0x79d   :  { %v1377_v30 = vpop.eup %1376 }
 0x79e   :  { %546 = vrot.lane.b32.xlu1 %v1377_v30, %s1520_s3 }
 0x810   :  { %v547_v31 = vpop.permute.xlu1 %546 }
 0x811   :  { %v549_v32 = vmul.f32 %v1375_v20, %v547_v31 }
 0x813   :  { %551 = vrot.lane.b32.xlu0 %v549_v32, %s1521_s26 }
 0x885   :  { %v552_v33 = vpop.permute.xlu0 %551 }
 0x886   :  { %555 = vst.msk [vmem:[#allocation11 + $0x28] sm:$0xff] %vm71_vm1, %v552_v33  ;;  %1244 = vmatmul.mubr.msk.f32.vlgmr.msra.gmra.mrb[4].mxu1 %vm71_vm1, %v552_v33 }
 0x887   :  { %1326 = vmatpush3.bf16.msra.mxu1 %v1609_v8  ;;  %1265 = vmatprep.mubr.msk.f32.mxu1 %vm1518_vm0, %v1519_v1 }
 0x888   :  { %1327 = vmatprep.subr.bf16.mxu1 %v1517_v0 }
 0x88b   :  { %1329 = vmatpush3.bf16.msra.mxu1 %v1612_v13 }
 0x88c   :  { %1336 = vmatprep.subr.bf16.mxu1 %v1517_v0 }
 0x959   :  { %v626_v35 = vpop.f32.mrb[4].mxu1 }
 0x95a   :  { %v630_v36 = vadd.f32 %v626_v35, %v1651_v34  ;;  %v1245_v37 = vpop.f32.mrb[5].mxu1 }
 0x95c   :  { %1378 = vtanh.f32 %v630_v36  ;;  %v1127_v39 = vmul.f32 -1.442695, %v630_v36 }
 0x95e   :  { %1380 = vpow2.f32 %v1127_v39 }
 0x966   :  { %v1379_v38 = vpop.eup %1378 }
 0x967   :  { %640 = vrot.lane.b32.xlu1 %v1379_v38, %s1520_s3 }
 0x968   :  { %v1381_v40 = vpop.eup %1380 }
 0x969   :  { %v634_v41 = vadd.f32 1.0, %v1381_v40 }
 0x96b   :  { %1382 = vrcp.f32 %v634_v41 }
 0x975   :  { %v1383_v42 = vpop.eup %1382 }
 0x976   :  { %v638_v45 = vmul.f32 %v1383_v42, %v543_v28 }
 0x9d9   :  { %v641_v43 = vpop.permute.xlu1 %640 }
 0x9da   :  { %v643_v44 = vmul.f32 %v1383_v42, %v641_v43 }
 0x9dc   :  { %645 = vrot.lane.b32.xlu0 %v643_v44, %s1521_s26 }
 0xa4e   :  { %v646_v46 = vpop.permute.xlu0 %645 }
 0xa4f   :  { %v648_v47 = vadd.f32 %v646_v46, %v638_v45 }
 0xa51   :  { %1384 = vtanh.f32 %v648_v47 }
 0xa5b   :  { %v1385_v34 = vpop.eup %1384 }
 0xa5c   :  { %651 = vrot.lane.b32.xlu1 %v1385_v34, %s1520_s3 }
 0xace   :  { %v652_v48 = vpop.permute.xlu1 %651 }
 0xacf   :  { %v654_v49 = vmul.f32 %v1383_v42, %v652_v48 }
 0xad1   :  { %656 = vrot.lane.b32.xlu0 %v654_v49, %s1521_s26 }
 0xb43   :  { %v657_v50 = vpop.permute.xlu0 %656 }
 0xb44   :  { %660 = vst.msk [vmem:[#allocation11 + $0x20] sm:$0xff] %vm71_vm1, %v657_v50  ;;  %1255 = vmatmul.mubr.msk.f32.vlgmr.msra.gmra.mrb[10].mxu0 %vm71_vm1, %v657_v50 }
 0xb45   :  { %1332 = vmatpush3.bf16.msra.mxu0 %v1609_v8  ;;  %1276 = vmatprep.mubr.msk.f32.mxu0 %vm1518_vm0, %v1519_v1 }
 0xb46   :  { %1333 = vmatprep.subr.bf16.mxu0 %v1517_v0 }
 0xb49   :  { %1335 = vmatpush3.bf16.msra.mxu0 %v1612_v13 }
 0xc17   :  { %v731_v51 = vpop.f32.mrb[10].mxu0 }
 0xc18   :  { %v735_v52 = vadd.f32 %v731_v51, %v1645_v26  ;;  %v1256_v53 = vpop.f32.mrb[11].mxu0 }
 0xc1a   :  { %1386 = vtanh.f32 %v735_v52  ;;  %v1129_v55 = vmul.f32 -1.442695, %v735_v52 }
 0xc1c   :  { %1388 = vpow2.f32 %v1129_v55 }
 0xc24   :  { %v1387_v54 = vpop.eup %1386 }
 0xc25   :  { %745 = vrot.lane.b32.xlu1 %v1387_v54, %s1520_s3 }
 0xc26   :  { %v1389_v56 = vpop.eup %1388 }
 0xc27   :  { %v739_v57 = vadd.f32 1.0, %v1389_v56 }
 0xc29   :  { %1390 = vrcp.f32 %v739_v57 }
 0xc33   :  { %v1391_v58 = vpop.eup %1390 }
 0xc34   :  { %v743_v61 = vmul.f32 %v1391_v58, %v648_v47 }
 0xc97   :  { %v746_v59 = vpop.permute.xlu1 %745 }
 0xc98   :  { %v748_v60 = vmul.f32 %v1391_v58, %v746_v59 }
 0xc9a   :  { %750 = vrot.lane.b32.xlu0 %v748_v60, %s1521_s26 }
 0xd0c   :  { %v751_v62 = vpop.permute.xlu0 %750 }
 0xd0d   :  { %v753_v63 = vadd.f32 %v751_v62, %v743_v61 }
 0xd0f   :  { %1392 = vtanh.f32 %v753_v63 }
 0xd19   :  { %v1393_v26 = vpop.eup %1392 }
 0xd1a   :  { %756 = vrot.lane.b32.xlu1 %v1393_v26, %s1520_s3 }
 0xd8c   :  { %v757_v2 = vpop.permute.xlu1 %756 }
 0xd8d   :  { %v759_v3 = vmul.f32 %v1391_v58, %v757_v2 }
 0xd8f   :  { %761 = vrot.lane.b32.xlu0 %v759_v3, %s1521_s26 }
 0xe01   :  { %v762_v4 = vpop.permute.xlu0 %761 }
 0xe02   :  { %765 = vst.msk [vmem:[#allocation11 + $0x18] sm:$0xff] %vm71_vm1, %v762_v4  ;;  %1266 = vmatmul.mubr.msk.f32.vlgmr.msra.gmra.mrb[6].mxu1 %vm71_vm1, %v762_v4 }
 0xe03   :  { %1338 = vmatpush3.bf16.msra.mxu1 %v1609_v8  ;;  %1287 = vmatprep.mubr.msk.f32.mxu1 %vm1518_vm0, %v1519_v1 }
 0xe04   :  { %1339 = vmatprep.subr.bf16.mxu1 %v1517_v0 }
 0xe07   :  { %1341 = vmatpush3.bf16.msra.mxu1 %v1612_v13 }
 0xed5   :  { %v836_v5 = vpop.f32.mrb[6].mxu1 }
 0xed6   :  { %v840_v6 = vadd.f32 %v836_v5, %v1647_v29  ;;  %v1267_v7 = vpop.f32.mrb[7].mxu1 }
 0xed8   :  { %1394 = vtanh.f32 %v840_v6  ;;  %v1131_v10 = vmul.f32 -1.442695, %v840_v6 }
 0xeda   :  { %1396 = vpow2.f32 %v1131_v10 }
 0xee2   :  { %v1395_v9 = vpop.eup %1394 }
 0xee3   :  { %850 = vrot.lane.b32.xlu1 %v1395_v9, %s1520_s3 }
 0xee4   :  { %v1397_v11 = vpop.eup %1396 }
 0xee5   :  { %v844_v12 = vadd.f32 1.0, %v1397_v11 }
 0xee7   :  { %1398 = vrcp.f32 %v844_v12 }
 0xef1   :  { %v1399_v8 = vpop.eup %1398 }
 0xef2   :  { %v848_v0 = vmul.f32 %v1399_v8, %v753_v63 }
 0xf55   :  { %v851_v14 = vpop.permute.xlu1 %850 }
 0xf56   :  { %v853_v1 = vmul.f32 %v1399_v8, %v851_v14 }
 0xf58   :  { %855 = vrot.lane.b32.xlu0 %v853_v1, %s1521_s26 }
 0xfca   :  { %v856_v13 = vpop.permute.xlu0 %855 }
 0xfcb   :  { %v858_v15 = vadd.f32 %v856_v13, %v848_v0 }
 0xfcd   :  { %1400 = vtanh.f32 %v858_v15 }
 0xfd7   :  { %v1401_v29 = vpop.eup %1400 }
 0xfd8   :  { %861 = vrot.lane.b32.xlu1 %v1401_v29, %s1520_s3 }
0x104a   :  { %v862_v16 = vpop.permute.xlu1 %861 }
0x104b   :  { %v864_v17 = vmul.f32 %v1399_v8, %v862_v16 }
0x104d   :  { %866 = vrot.lane.b32.xlu0 %v864_v17, %s1521_s26 }
0x10bf   :  { %v867_v18 = vpop.permute.xlu0 %866 }
0x10c0   :  { %870 = vst.msk [vmem:[#allocation11 + $0x10] sm:$0xff] %vm71_vm1, %v867_v18  ;;  %1277 = vmatmul.mubr.msk.f32.vlgmr.msra.gmra.mrb[12].mxu0 %vm71_vm1, %v867_v18 }
0x1193   :  { %v941_v19 = vpop.f32.mrb[12].mxu0 }
0x1194   :  { %v945_v20 = vadd.f32 %v941_v19, %v1641_v22  ;;  %v1278_v21 = vpop.f32.mrb[13].mxu0 }
0x1196   :  { %1402 = vtanh.f32 %v945_v20  ;;  %v1133_v25 = vmul.f32 -1.442695, %v945_v20 }
0x1198   :  { %1404 = vpow2.f32 %v1133_v25 }
0x11a0   :  { %v1403_v23 = vpop.eup %1402 }
0x11a1   :  { %955 = vrot.lane.b32.xlu1 %v1403_v23, %s1520_s3 }
0x11a2   :  { %v1405_v27 = vpop.eup %1404 }
0x11a3   :  { %v949_v28 = vadd.f32 1.0, %v1405_v27 }
0x11a5   :  { %1406 = vrcp.f32 %v949_v28 }
0x11af   :  { %v1407_v30 = vpop.eup %1406 }
0x11b0   :  { %v953_v33 = vmul.f32 %v1407_v30, %v858_v15 }
0x1213   :  { %v956_v31 = vpop.permute.xlu1 %955 }
0x1214   :  { %v958_v32 = vmul.f32 %v1407_v30, %v956_v31 }
0x1216   :  { %960 = vrot.lane.b32.xlu0 %v958_v32, %s1521_s26 }
0x1288   :  { %v961_v35 = vpop.permute.xlu0 %960 }
0x1289   :  { %v963_v36 = vadd.f32 %v961_v35, %v953_v33 }
0x128b   :  { %1408 = vtanh.f32 %v963_v36 }
0x1295   :  { %v1409_v22 = vpop.eup %1408 }
0x1296   :  { %966 = vrot.lane.b32.xlu1 %v1409_v22, %s1520_s3 }
0x1308   :  { %v967_v37 = vpop.permute.xlu1 %966 }
0x1309   :  { %v969_v38 = vmul.f32 %v1407_v30, %v967_v37 }
0x130b   :  { %971 = vrot.lane.b32.xlu0 %v969_v38, %s1521_s26 }
0x137d   :  { %v972_v39 = vpop.permute.xlu0 %971 }
0x137e   :  { %975 = vst.msk [vmem:[#allocation11 + $0x8] sm:$0xff] %vm71_vm1, %v972_v39  ;;  %1288 = vmatmul.mubr.msk.f32.vlgmr.msra.gmra.mrb[8].mxu1 %vm71_vm1, %v972_v39 }
0x1451   :  { %v1045_v40 = vpop.f32.mrb[8].mxu1 }
0x1452   :  { %v1049_v41 = vadd.f32 %v1045_v40, %v1643_v24  ;;  %v1289_v42 = vpop.f32.mrb[9].mxu1 }
0x1454   :  { %1410 = vtanh.f32 %v1049_v41  ;;  %v1135_v44 = vmul.f32 -1.442695, %v1049_v41 }
0x1456   :  { %1412 = vpow2.f32 %v1135_v44 }
0x145e   :  { %v1411_v43 = vpop.eup %1410 }
0x145f   :  { %1059 = vrot.lane.b32.xlu1 %v1411_v43, %s1520_s3 }
0x1460   :  { %v1413_v45 = vpop.eup %1412 }
0x1461   :  { %v1053_v46 = vadd.f32 1.0, %v1413_v45 }
0x1463   :  { %1414 = vrcp.f32 %v1053_v46 }
0x146d   :  { %v1415_v47 = vpop.eup %1414 }
0x146e   :  { %v1057_v49 = vmul.f32 %v1415_v47, %v963_v36 }
0x14d1   :  { %v1060_v34 = vpop.permute.xlu1 %1059 }
0x14d2   :  { %v1062_v48 = vmul.f32 %v1415_v47, %v1060_v34 }
0x14d4   :  { %1064 = vrot.lane.b32.xlu0 %v1062_v48, %s1521_s26 }
0x1546   :  { %v1065_v50 = vpop.permute.xlu0 %1064 }
0x1547   :  { %v1067_v51 = vadd.f32 %v1065_v50, %v1057_v49 }
0x1549   :  { %1416 = vtanh.f32 %v1067_v51 }
0x1553   :  { %v1417_v24 = vpop.eup %1416 }
0x1554   :  { %1070 = vrot.lane.b32.xlu1 %v1417_v24, %s1520_s3 }
0x1558   :  { %1081 = vrot.lane.b32.xlu1 %v1067_v51, %s1522_s29 }
0x15c6   :  { %v1071_v52 = vpop.permute.xlu1 %1070 }
0x15c7   :  { %v1073_v53 = vmul.f32 %v1415_v47, %v1071_v52 }
0x15c9   :  { %1075 = vrot.lane.b32.xlu0 %v1073_v53, %s1521_s26 }
0x15ca   :  { %v1082_v54 = vpop.permute.xlu1 %1081 }
0x15cb   :  { %1084 = vst.msk [vmem:[#allocation3] sm:$0xff] %vm71_vm1, %v1082_v54 }
0x163b   :  { %v1076_v55 = vpop.permute.xlu0 %1075 }
0x163c   :  { %1078 = vst.msk [vmem:[#allocation11] sm:$0xff] %vm71_vm1, %v1076_v55  ;;  %1079 = vst.msk [vmem:[#allocation2] sm:$0xff] %vm71_vm1, %v1076_v55 }
0x163d   :  { %1495 = shalt.err (!%p1492_p0)
}
0x163e   :  { %s1496_s9 = scalar_lea.hbm %s1756_s4, 1024 }
0x163f   :  { %p1497_p1 = scmp.ne.s32.totalorder %s1756_s4, %s1496_s9  ;;  %p1500_p2 = scmp.lt.u32.totalorder %s1496_s9, %s1756_s4 }
0x1641   :  { %p1502_p3 = pnand %p1500_p2, %p1497_p1 }
0x1643   :  { %1505 = shalt.err (!%p1502_p3)
}
0x1644   :  { %1100 = dma.vmem_to_hbm [thread:$0]  %s1095_s5, 1024, %s1756_s4, [#allocation7], %s1514_s27, %s1514_s27, %s1515_s28  }
0x1645   :  { %1510 = dma.done.wait [#allocation7], 1024  }
0x1646   :  { %1511 = vsyncadd [#allocation7], 4294966272 }
0x1647   :  { %1104 = vsyncpa [#allocation6], 1 }
0x1648   :  { %1105 = vsyncpa [#allocation9], 1 }
0x1649   :  { %1106 = vsyncpa [#allocation7], 1 }

</bundles_post_ra>
